<compile_context>
chip_gen: v7x
topology: tpu7x:2x2x1
jax: 0.10.0
libtpu: 0.0.40
codegen_flags: <defaults>
</compile_context>

<pallas_src>
import functools

import jax
import jax.numpy as jnp
from jax import lax
from jax.experimental import pallas as pl
from jax.experimental.pallas import tpu as pltpu

BN_EPS = 1e-5


def autopad(k, p=None, d=1):
    """Pad to 'same' shape outputs (PyTorch reference helper, int kernel)."""
    if d > 1:
        k = d * (k - 1) + 1
    if p is None:
        p = k // 2
    return p


def _cdiv(a, b):
    return -(-a // b)


# -------------------------------- Pallas kernel ------------------------------ #

def conv1_kernel(x_ref, w_ref, b_ref, o_ref, xg_ref, *,
                 bblk, h, ho, kh, stride, pad, dil):
    """Fused Conv2d(+folded BN) + ReLU for one block of B_blk images.

    x_ref : (B_blk*H, W*Cin)       f32 input rows, W*Cin on the lanes
    w_ref : (kh*W*Cin, Wo*Cout)    bf16 banded BN-folded weight (kw taps,
                                   W padding and W stride folded into the band)
    b_ref : (1, Wo*Cout)           f32 BN-folded bias tiled across Wo
    o_ref : (B_blk*Ho, Wo*Cout)    f32 lane-dense output
    xg_ref: (B_blk*Ho, kh*W*Cin)   bf16 gather scratch (im2col over H only)
    """
    wcin = x_ref.shape[1]

    # ---- Gather the kh height taps (applying the H 'same' padding and the H
    # stride) into one (B_blk*Ho, kh*W*Cin) bf16 MXU operand.  All offsets and
    # extents below are static Python ints -> static slices.
    for i in range(kh):
        off = i * dil - pad
        yo_lo = max(0, _cdiv(-off, stride))            # first valid output row
        yo_hi = min(ho, (h - 1 - off) // stride + 1)   # one past last valid row
        yo_hi = max(yo_hi, yo_lo)
        col = i * wcin
        for b in range(bblk):
            base = b * ho
            if yo_lo > 0:        # top 'same' padding -> zeros
                xg_ref[pl.ds(base, yo_lo), pl.ds(col, wcin)] = (
                    jnp.zeros((yo_lo, wcin), xg_ref.dtype))
            if yo_hi < ho:       # bottom 'same' padding -> zeros
                xg_ref[pl.ds(base + yo_hi, ho - yo_hi), pl.ds(col, wcin)] = (
                    jnp.zeros((ho - yo_hi, wcin), xg_ref.dtype))
            nrows = yo_hi - yo_lo
            if nrows > 0:
                hstart = b * h + stride * yo_lo + off
                if stride == 1:
                    rows = x_ref[pl.ds(hstart, nrows), :]
                else:
                    # Strided H-read done ONCE here (during the gather),
                    # not once per tap per matmul.
                    rows = x_ref[pl.ds(hstart, nrows, stride=stride), :]
                xg_ref[pl.ds(base + yo_lo, nrows), pl.ds(col, wcin)] = (
                    rows.astype(xg_ref.dtype))

    # ---- One MXU issue: M = B_blk*Ho, K = kh*W*Cin, N = Wo*Cout,
    # bf16 x bf16 with f32 accumulation.  Bias add + ReLU fused on the VPU.
    acc = jnp.dot(xg_ref[...], w_ref[...], preferred_element_type=jnp.float32)
    o_ref[...] = jnp.maximum(acc + b_ref[...], 0.0)


# ---------------------------- parameter preparation -------------------------- #

def fold_batchnorm(w_oihw, b, gamma, beta, r_mean, r_var):
    """Fold inference-mode BatchNorm2d into the conv weights / bias."""
    scale = gamma / jnp.sqrt(r_var + BN_EPS)
    w_folded = jnp.transpose(w_oihw, (2, 3, 1, 0)) * scale        # (kh, kw, cin, cout)
    b_folded = (b - r_mean) * scale + beta                        # (cout,)
    return w_folded, b_folded


def build_banded_weight(w_folded, b_folded, *, width, stride, pad, dilation=1,
                        weight_dtype=jnp.bfloat16):
    """Fold the kw width-taps, W 'same' padding and W-stride into a band matrix.

    Returns wband_flat (kh*W*Cin, Wo*Cout) in bf16 and bias (1, Wo*Cout) in f32
    such that, with the in-kernel H-tap gather,
      out = relu( xg @ wband_flat + bias ).
    Done once at parameter-prep time (like the BN fold), not per forward pass.
    """
    kh, kw, cin, cout = w_folded.shape
    keff = dilation * (kw - 1) + 1
    wo = (width + 2 * pad - keff) // stride + 1
    wband = jnp.zeros((kh, width * cin, wo * cout), jnp.float32)
    for xo in range(wo):
        for j in range(kw):
            w_in = stride * xo + j * dilation - pad
            if 0 <= w_in < width:            # out-of-range taps == zero padding
                wband = wband.at[:, w_in * cin:(w_in + 1) * cin,
                                 xo * cout:(xo + 1) * cout].set(w_folded[:, j])
    wband_flat = wband.reshape(kh * width * cin, wo * cout).astype(weight_dtype)
    bias = jnp.tile(b_folded, wo)[None, :].astype(jnp.float32)
    return wband_flat, bias


# ----------------------------------- forward --------------------------------- #

def conv1_forward(x_nchw, wband_flat, bias, *, k, s, pad, d, cout, b_blk=None):
    """Conv1.forward: Conv2d(k, s, autopad, d) + BatchNorm2d (folded) + ReLU."""
    n, cin, h, w = x_nchw.shape
    keff = d * (k - 1) + 1
    ho = (h + 2 * pad - keff) // s + 1
    wo = (w + 2 * pad - keff) // s + 1
    assert wband_flat.shape == (k * w * cin, wo * cout), wband_flat.shape

    if b_blk is None:
        b_blk = n            # tiny-N demo: one grid step, M = N*Ho MXU rows
    assert n % b_blk == 0

    # Boundary layout change only: NCHW -> (N*H, W*Cin), W*Cin on the lanes.
    x = jnp.transpose(x_nchw, (0, 2, 3, 1)).reshape(n * h, w * cin)

    out = pl.pallas_call(
        functools.partial(conv1_kernel, bblk=b_blk, h=h, ho=ho, kh=k,
                          stride=s, pad=pad, dil=d),
        out_shape=jax.ShapeDtypeStruct((n * ho, wo * cout), jnp.float32),
        grid_spec=pltpu.PrefetchScalarGridSpec(
            num_scalar_prefetch=0,
            grid=(n // b_blk,),
            in_specs=[
                pl.BlockSpec((b_blk * h, w * cin), lambda i: (i, 0)),
                pl.BlockSpec((k * w * cin, wo * cout), lambda i: (0, 0)),
                pl.BlockSpec((1, wo * cout), lambda i: (0, 0)),
            ],
            out_specs=pl.BlockSpec((b_blk * ho, wo * cout), lambda i: (i, 0)),
            scratch_shapes=[
                pltpu.VMEM((b_blk * ho, k * w * cin), jnp.bfloat16),
            ],
        ),
        compiler_params=pltpu.CompilerParams(
            # Batch blocks are independent; with b_blk < N this shards across
            # both TensorCores on v7x (no effect on single-TC v5e/v6e).
            dimension_semantics=("parallel",),
        ),
    )(x, wband_flat, bias)

    # Free reshape + the unavoidable boundary transpose back to PyTorch's NCHW.
    return jnp.transpose(out.reshape(n, ho, wo, cout), (0, 3, 1, 2))


# ------------------------------------ main ------------------------------------ #

if __name__ == "__main__":
    key = jax.random.PRNGKey(0)
    kx, kw_, kb, kg, kbe, km, kv = jax.random.split(key, 7)

    # Conv1(in_channels=4, out_channels=16, k=3, s=2) on a (2, 4, 16, 16) input.
    N, CIN, H, W = 2, 4, 16, 16
    COUT, K, S, D = 16, 3, 2, 1
    PAD = autopad(K, None, D)                                     # 'same' pad = 1

    x = jax.random.normal(kx, (N, CIN, H, W), jnp.float32)

    # PyTorch-like raw parameters: Conv2d weight (OIHW) + bias, BN affine + stats.
    w_oihw = 0.1 * jax.random.normal(kw_, (COUT, CIN, K, K), jnp.float32)
    b = 0.1 * jax.random.normal(kb, (COUT,), jnp.float32)
    gamma = 1.0 + 0.1 * jax.random.normal(kg, (COUT,), jnp.float32)
    beta = 0.1 * jax.random.normal(kbe, (COUT,), jnp.float32)
    r_mean = 0.1 * jax.random.normal(km, (COUT,), jnp.float32)
    r_var = 1.0 + 0.1 * jax.random.uniform(kv, (COUT,), jnp.float32)

    # One-time parameter prep (BN fold + bf16 banded weight), like deploy-time folding.
    w_folded, b_folded = fold_batchnorm(w_oihw, b, gamma, beta, r_mean, r_var)
    wband_flat, bias = build_banded_weight(w_folded, b_folded, width=W,
                                           stride=S, pad=PAD, dilation=D)

    fwd = jax.jit(functools.partial(conv1_forward, k=K, s=S, pad=PAD, d=D, cout=COUT))
    y = fwd(x, wband_flat, bias)
    jax.block_until_ready(y)

    KEFF = D * (K - 1) + 1
    HO = (H + 2 * PAD - KEFF) // S + 1
    WO = (W + 2 * PAD - KEFF) // S + 1
    assert y.shape == (N, COUT, HO, WO), y.shape
    assert y.dtype == jnp.float32

    # Numerical check against a pure-XLA reference of the same inference-mode Conv1.
    scale = gamma / jnp.sqrt(r_var + BN_EPS)
    ref = lax.conv_general_dilated(
        x, w_oihw * scale[:, None, None, None],
        window_strides=(S, S), padding=[(PAD, PAD), (PAD, PAD)],
        rhs_dilation=(D, D),
        dimension_numbers=("NCHW", "OIHW", "NCHW"),
        precision=lax.Precision.HIGHEST)
    ref = jnp.maximum(ref + ((b - r_mean) * scale + beta)[None, :, None, None], 0.0)
    assert jnp.allclose(y, ref, atol=2e-2, rtol=2e-2), float(jnp.max(jnp.abs(y - ref)))

    print("KERNEL_OK")
</pallas_src>

<mosaic_0001>
module attributes {stable_mosaic.version = 11 : i64} {
  func.func @conv1_kernel(%arg0: i32, %arg1: memref<32x64xf32, #tpu.memory_space<vmem>>, %arg2: memref<192x128xbf16, #tpu.memory_space<vmem>>, %arg3: memref<1x128xf32, #tpu.memory_space<vmem>>, %arg4: memref<16x128xf32, #tpu.memory_space<vmem>>, %arg5: memref<16x192xbf16, #tpu.memory_space<vmem>>) attributes {dimension_semantics = [#tpu.dimension_semantics<parallel>], iteration_bounds = array<i64: 1>, scalar_prefetch = 0 : i64, scratch_operands = 1 : i64, tpu.core_type = #tpu.core_type<tc>, window_params = [{transform_indices = @transform_0, window_bounds = array<i64: 32, 64>}, {pipeline_mode = #tpu.pipeline_mode<synchronous>, transform_indices = @transform_1, window_bounds = array<i64: 192, 128>}, {pipeline_mode = #tpu.pipeline_mode<synchronous>, transform_indices = @transform_2, window_bounds = array<i64: 1, 128>}, {transform_indices = @transform_3, window_bounds = array<i64: 16, 128>}]} {
    %cst = arith.constant 0.000000e+00 : bf16
    %0 = vector.broadcast %cst : bf16 to vector<1x64xbf16>
    %c0 = arith.constant 0 : index
    %c0_0 = arith.constant 0 : index
    %1 = vector.load %arg5[%c0, %c0_0] : memref<16x192xbf16, #tpu.memory_space<vmem>>, vector<1x64xbf16>
    tpu.vector_store %arg5[%c0, %c0_0], %0 {strides = array<i32>} : memref<16x192xbf16, #tpu.memory_space<vmem>>, vector<1x64xbf16>,
    %c1 = arith.constant 1 : index
    %c0_1 = arith.constant 0 : index
    %2 = tpu.strided_load %arg1[%c1, %c0_1] {strides = array<i32: 2, 1>} : memref<32x64xf32, #tpu.memory_space<vmem>>, vector<7x64xf32>
    %3 = arith.truncf %2 : vector<7x64xf32> to vector<7x64xbf16>
    %c1_2 = arith.constant 1 : index
    %c0_3 = arith.constant 0 : index
    %4 = vector.load %arg5[%c1_2, %c0_3] : memref<16x192xbf16, #tpu.memory_space<vmem>>, vector<7x64xbf16>
    tpu.vector_store %arg5[%c1_2, %c0_3], %3 {strides = array<i32>} : memref<16x192xbf16, #tpu.memory_space<vmem>>, vector<7x64xbf16>,
    %cst_4 = arith.constant 0.000000e+00 : bf16
    %5 = vector.broadcast %cst_4 : bf16 to vector<1x64xbf16>
    %c8 = arith.constant 8 : index
    %c0_5 = arith.constant 0 : index
    %6 = vector.load %arg5[%c8, %c0_5] : memref<16x192xbf16, #tpu.memory_space<vmem>>, vector<1x64xbf16>
    tpu.vector_store %arg5[%c8, %c0_5], %5 {strides = array<i32>} : memref<16x192xbf16, #tpu.memory_space<vmem>>, vector<1x64xbf16>,
    %c17 = arith.constant 17 : index
    %c0_6 = arith.constant 0 : index
    %7 = tpu.strided_load %arg1[%c17, %c0_6] {strides = array<i32: 2, 1>} : memref<32x64xf32, #tpu.memory_space<vmem>>, vector<7x64xf32>
    %8 = arith.truncf %7 : vector<7x64xf32> to vector<7x64xbf16>
    %c9 = arith.constant 9 : index
    %c0_7 = arith.constant 0 : index
    %9 = vector.load %arg5[%c9, %c0_7] : memref<16x192xbf16, #tpu.memory_space<vmem>>, vector<7x64xbf16>
    tpu.vector_store %arg5[%c9, %c0_7], %8 {strides = array<i32>} : memref<16x192xbf16, #tpu.memory_space<vmem>>, vector<7x64xbf16>,
    %c0_8 = arith.constant 0 : index
    %c0_9 = arith.constant 0 : index
    %10 = tpu.strided_load %arg1[%c0_8, %c0_9] {strides = array<i32: 2, 1>} : memref<32x64xf32, #tpu.memory_space<vmem>>, vector<8x64xf32>
    %11 = arith.truncf %10 : vector<8x64xf32> to vector<8x64xbf16>
    %c0_10 = arith.constant 0 : index
    %c64 = arith.constant 64 : index
    %12 = vector.load %arg5[%c0_10, %c64] : memref<16x192xbf16, #tpu.memory_space<vmem>>, vector<8x64xbf16>
    tpu.vector_store %arg5[%c0_10, %c64], %11 {strides = array<i32>} : memref<16x192xbf16, #tpu.memory_space<vmem>>, vector<8x64xbf16>,
    %c16 = arith.constant 16 : index
    %c0_11 = arith.constant 0 : index
    %13 = tpu.strided_load %arg1[%c16, %c0_11] {strides = array<i32: 2, 1>} : memref<32x64xf32, #tpu.memory_space<vmem>>, vector<8x64xf32>
    %14 = arith.truncf %13 : vector<8x64xf32> to vector<8x64xbf16>
    %c8_12 = arith.constant 8 : index
    %c64_13 = arith.constant 64 : index
    %15 = vector.load %arg5[%c8_12, %c64_13] : memref<16x192xbf16, #tpu.memory_space<vmem>>, vector<8x64xbf16>
    tpu.vector_store %arg5[%c8_12, %c64_13], %14 {strides = array<i32>} : memref<16x192xbf16, #tpu.memory_space<vmem>>, vector<8x64xbf16>,
    %c1_14 = arith.constant 1 : index
    %c0_15 = arith.constant 0 : index
    %16 = tpu.strided_load %arg1[%c1_14, %c0_15] {strides = array<i32: 2, 1>} : memref<32x64xf32, #tpu.memory_space<vmem>>, vector<8x64xf32>
    %17 = arith.truncf %16 : vector<8x64xf32> to vector<8x64xbf16>
    %c0_16 = arith.constant 0 : index
    %c128 = arith.constant 128 : index
    %18 = vector.load %arg5[%c0_16, %c128] : memref<16x192xbf16, #tpu.memory_space<vmem>>, vector<8x64xbf16>
    tpu.vector_store %arg5[%c0_16, %c128], %17 {strides = array<i32>} : memref<16x192xbf16, #tpu.memory_space<vmem>>, vector<8x64xbf16>,
    %c17_17 = arith.constant 17 : index
    %c0_18 = arith.constant 0 : index
    %19 = tpu.strided_load %arg1[%c17_17, %c0_18] {strides = array<i32: 2, 1>} : memref<32x64xf32, #tpu.memory_space<vmem>>, vector<8x64xf32>
    %20 = arith.truncf %19 : vector<8x64xf32> to vector<8x64xbf16>
    %c8_19 = arith.constant 8 : index
    %c128_20 = arith.constant 128 : index
    %21 = vector.load %arg5[%c8_19, %c128_20] : memref<16x192xbf16, #tpu.memory_space<vmem>>, vector<8x64xbf16>
    tpu.vector_store %arg5[%c8_19, %c128_20], %20 {strides = array<i32>} : memref<16x192xbf16, #tpu.memory_space<vmem>>, vector<8x64xbf16>,
    %c0_21 = arith.constant 0 : index
    %c0_22 = arith.constant 0 : index
    %22 = vector.load %arg5[%c0_21, %c0_22] : memref<16x192xbf16, #tpu.memory_space<vmem>>, vector<16x192xbf16>
    %c0_23 = arith.constant 0 : index
    %c0_24 = arith.constant 0 : index
    %23 = vector.load %arg2[%c0_23, %c0_24] : memref<192x128xbf16, #tpu.memory_space<vmem>>, vector<192x128xbf16>
    %cst_25 = arith.constant dense<0.000000e+00> : vector<16x128xf32>
    %24 = tpu.matmul %22, %23, %cst_25 {dimension_numbers = #tpu.dot_dimension_numbers<[1], [0], [0], [1], [0, 0, 1, 1], [], []>} : vector<16x192xbf16>, vector<192x128xbf16>, vector<16x128xf32> -> vector<16x128xf32>
    %c0_26 = arith.constant 0 : index
    %c0_27 = arith.constant 0 : index
    %25 = vector.load %arg3[%c0_26, %c0_27] : memref<1x128xf32, #tpu.memory_space<vmem>>, vector<1x128xf32>
    %26 = vector.broadcast %25 : vector<1x128xf32> to vector<16x128xf32>
    %27 = arith.addf %24, %26 : vector<16x128xf32>
    %cst_28 = arith.constant 0.000000e+00 : f32
    %28 = vector.broadcast %cst_28 : f32 to vector<16x128xf32>
    %29 = arith.maximumf %27, %28 : vector<16x128xf32>
    %c0_29 = arith.constant 0 : index
    %c0_30 = arith.constant 0 : index
    %30 = vector.load %arg4[%c0_29, %c0_30] : memref<16x128xf32, #tpu.memory_space<vmem>>, vector<16x128xf32>
    tpu.vector_store %arg4[%c0_29, %c0_30], %29 {strides = array<i32>} : memref<16x128xf32, #tpu.memory_space<vmem>>, vector<16x128xf32>,
    return
  }
  func.func @transform_0(%arg0: i32) -> (i32, i32) {
    %c0_i32 = arith.constant 0 : i32
    %c0_i32_0 = arith.constant 0 : i32
    return %arg0, %c0_i32 : i32, i32
  }
  func.func @transform_1(%arg0: i32) -> (i32, i32) {
    %c0_i32 = arith.constant 0 : i32
    %c0_i32_0 = arith.constant 0 : i32
    %c0_i32_1 = arith.constant 0 : i32
    return %c0_i32, %c0_i32_0 : i32, i32
  }
  func.func @transform_2(%arg0: i32) -> (i32, i32) {
    %c0_i32 = arith.constant 0 : i32
    %c0_i32_0 = arith.constant 0 : i32
    %c0_i32_1 = arith.constant 0 : i32
    return %c0_i32, %c0_i32_0 : i32, i32
  }
  func.func @transform_3(%arg0: i32) -> (i32, i32) {
    %c0_i32 = arith.constant 0 : i32
    %c0_i32_0 = arith.constant 0 : i32
    return %arg0, %c0_i32 : i32, i32
  }
}

</mosaic_0001>

<bundles_post_ra>
// kernel: conv1_forward.1
= control target key start
LH: loop header
LB: loop body
LE: loop exit
PB: predicated region body
PF: predicated region fallthrough
CT: control target
= control target key end

     0   :  { %v282_v2 = vmov 0   ;;  %vm16_vm0 = vsmask.f32 256  ;;  %vm32_vm1 = vcmask 519168   ;;  %s283_s20 = smov 64   ;;  %vm15_vm2 = vcmask 516096   ;;  %s384_s0 = inlined_call_operand.vmem [shape: f32[32,64], index: 0, kind: input, shape index: {}]   ;;  %s385_s1 = inlined_call_operand.vmem [shape: bf16[192,128], index: 1, kind: input, shape index: {}]   ;;  %s386_s2 = inlined_call_operand.vmem [shape: f32[1,128], index: 2, kind: input, shape index: {}]   ;;  %s387_s3 = inlined_call_operand.vmem [shape: f32[16,128], index: 3, kind: output, shape index: {}]  }
   0x1   :  { %v62_v0 = vld [vmem:[%s384_s0] ss:$2 sm:$0xff]  ;;  %v252_v1 = vld [vmem:[%s384_s0 + $0x1] ss:$2 sm:$0xff]  ;;  %200 = vmatprep.subr.bf16.mxu0 %v282_v2  ;;  %v251_v6 = vld [vmem:[%s384_s0 + $0x10] ss:$2 sm:$0xff] }
   0x2   :  { %v63_v3 = vpack.c.bf16 %v62_v0, %v62_v0  ;;  %v81_v4 = vpack.c.bf16 %v252_v1, %v252_v1  ;;  %v249_v5 = vld [vmem:[%s384_s0 + $0x1] ss:$2 sm:$0x7f]  ;;  %v72_v8 = vpack.c.bf16 %v251_v6, %v251_v6  ;;  %v253_v10 = vld [vmem:[%s384_s0 + $0x11] ss:$2 sm:$0xff]  ;;  %vm17_vm3 = vmand %vm15_vm2, %vm16_vm0  ;;  %vm38_vm4 = vcmask 520196  }
   0x3   :  { %v23_v7 = vpack.c.bf16 %v249_v5, %v249_v5  ;;  %v270_v9 = vld [vmem:[%s385_s1] sm:$0xff]   ;;  %v250_v11 = vld [vmem:[%s384_s0 + $0x11] ss:$2 sm:$0x7f]  ;;  %v271_v13 = vld [vmem:[%s385_s1 + $0x8] sm:$0xff]   ;;  %v85_v15 = vpack.c.bf16 %v253_v10, %v253_v10  ;;  %vm56_vm6 = vcmask 523268  }
   0x4   :  { %65 = vrot.lane.b32.xlu0 %v63_v3, %s283_s20  ;;  %83 = vst.msk [vmem:[#allocation2 + $0x8] sm:$0xf] %vm32_vm1, %v81_v4  ;;  %v74_v12 = vrot.slane %v72_v8, 4  ;;  %201 = vmatpush1.bf16.msra.mxu0 %v270_v9  ;;  %v272_v16 = vld [vmem:[%s385_s1 + $0x10] sm:$0xff]   ;;  %v46_v17 = vpack.c.bf16 %v250_v11, %v250_v11  ;;  %v273_v18 = vld [vmem:[%s385_s1 + $0x18] sm:$0xff]   ;;  %v274_v30 = vld [vmem:[%s385_s1 + $0x20] sm:$0xff]  }
   0x5   :  { %202 = vmatprep.subr.bf16.mxu0 %v282_v2  ;;  %v25_v14 = vshrl.u32 %v23_v7, 16  ;;  %v18_v19 = vld [vmem:[#allocation2] sm:$0x1]  ;;  %v87_v22 = vrot.slane %v85_v15, 4  ;;  %v28_v23 = vshll.u32 %v23_v7, 16  ;;  %vm196_vm11 = vcmask 523264  }
   0x6   :  { %v19_v21 = vsel %vm17_vm3, 0, %v18_v19  ;;  %vm39_vm5 = vsmask.f32 4352  ;;  %v41_v24 = vld [vmem:[#allocation2] sm:$0x10]  ;;  %v48_v25 = vshrl.u32 %v46_v17, 16 }
   0x7   :  { %v27_v20 = vrot.slane %v25_v14, 7  ;;  %20 = vst [vmem:[#allocation2] sm:$0x1] %v19_v21  ;;  %vm40_vm7 = vmand %vm38_vm4, %vm39_vm5  ;;  %v51_v26 = vshll.u32 %v46_v17, 16  ;;  %vm33_vm8 = vsmask.f32 7938 }
   0x8   :  { %75 = vrot.lane.b32.xlu0 %v74_v12, %s283_s20  ;;  %203 = vmatpush1.bf16.msra.mxu0 %v271_v13  ;;  %90 = vst.msk [vmem:[#allocation2 + $0x8] sm:$0xf0] %vm56_vm6, %v87_v22  ;;  %v42_v27 = vsel %vm40_vm7, 0, %v41_v24  ;;  %v50_v28 = vrot.slane %v48_v25, 3  ;;  %vm34_vm9 = vmand %vm32_vm1, %vm33_vm8  ;;  %vm57_vm10 = vsmask.f32 7954 }
   0x9   :  { %204 = vmatprep.subr.bf16.mxu0 %v282_v2  ;;  %43 = vst [vmem:[#allocation2] sm:$0x10] %v42_v27  ;;  %v53_v29 = vrot.slane %v51_v26, 4  ;;  %v30_v31 = vor.u32 %v28_v23, %v27_v20  ;;  %v275_v34 = vld [vmem:[%s385_s1 + $0x28] sm:$0xff]   ;;  %vm58_vm12 = vmand %vm56_vm6, %vm57_vm10  ;;  %v276_v39 = vld [vmem:[%s385_s1 + $0x30] sm:$0xff]   ;;  %vm68_vm13 = vcmask 1043968  }
   0xa   :  { %v277_v40 = vld [vmem:[%s385_s1 + $0x38] sm:$0xff]   ;;  %v278_v41 = vld [vmem:[%s385_s1 + $0x40] sm:$0xff]   ;;  %v279_v42 = vld [vmem:[%s385_s1 + $0x48] sm:$0xff]   ;;  %vm78_vm14 = vcmask 1048068  }
   0xb   :  { %v54_v33 = vor.u32 %v53_v29, %v50_v28  ;;  %v280_v43 = vld [vmem:[%s385_s1 + $0x50] sm:$0xff]   ;;  %v281_v44 = vld [vmem:[%s385_s1 + $0x58] sm:$0xff]   ;;  %v254_v48 = vld [vmem:[%s386_s2] ss:$0 sm:$0xff] }
   0xc   :  { %205 = vmatpush1.bf16.msra.mxu0 %v272_v16 }
   0xd   :  { %206 = vmatprep.subr.bf16.mxu0 %v282_v2 }
   0xe   :  { %v35_v32 = vld [vmem:[#allocation2] sm:$0xf] }
   0xf   :  { %v36_v35 = vsel %vm34_vm9, %v30_v31, %v35_v32  ;;  %v92_v36 = vld [vmem:[#allocation2 + $0x8] sm:$0xff] }
  0x10   :  { %207 = vmatpush1.bf16.msra.mxu0 %v273_v18  ;;  %37 = vst [vmem:[#allocation2] sm:$0xf] %v36_v35  ;;  %267 = vmatprep.mubr.msk.bf16.mxu0 %vm196_vm11, %v92_v36  ;;  %v59_v37 = vld [vmem:[#allocation2] sm:$0xf0] }
  0x11   :  { %208 = vmatprep.subr.bf16.mxu0 %v282_v2  ;;  %v60_v38 = vsel %vm58_vm12, %v54_v33, %v59_v37 }
  0x12   :  { %61 = vst [vmem:[#allocation2] sm:$0xf0] %v60_v38 }
  0x14   :  { %209 = vmatpush1.bf16.msra.mxu0 %v274_v30 }
  0x15   :  { %210 = vmatprep.subr.bf16.mxu0 %v282_v2 }
  0x18   :  { %211 = vmatpush1.bf16.msra.mxu0 %v275_v34 }
  0x19   :  { %212 = vmatprep.subr.bf16.mxu0 %v282_v2 }
  0x1c   :  { %213 = vmatpush1.bf16.msra.mxu0 %v276_v39 }
  0x1d   :  { %214 = vmatprep.subr.bf16.mxu0 %v282_v2 }
  0x20   :  { %215 = vmatpush1.bf16.msra.mxu0 %v277_v40 }
  0x21   :  { %216 = vmatprep.subr.bf16.mxu0 %v282_v2 }
  0x24   :  { %217 = vmatpush1.bf16.msra.mxu0 %v278_v41 }
  0x25   :  { %218 = vmatprep.subr.bf16.mxu0 %v282_v2 }
  0x28   :  { %219 = vmatpush1.bf16.msra.mxu0 %v279_v42 }
  0x29   :  { %220 = vmatprep.subr.bf16.mxu0 %v282_v2 }
  0x2c   :  { %221 = vmatpush1.bf16.msra.mxu0 %v280_v43 }
  0x2d   :  { %222 = vmatprep.subr.bf16.mxu0 %v282_v2 }
  0x30   :  { %223 = vmatpush1.bf16.msra.mxu0 %v281_v44 }
  0x76   :  { %v66_v45 = vpop.permute.xlu0 %65 }
  0x77   :  { %69 = vst.msk [vmem:[#allocation2] sm:$0xf] %vm68_vm13, %v66_v45 }
  0x7a   :  { %v76_v46 = vpop.permute.xlu0 %75 }
  0x7b   :  { %79 = vst.msk [vmem:[#allocation2] sm:$0xf0] %vm78_vm14, %v76_v46 }
  0x82   :  { %v91_v47 = vld [vmem:[#allocation2] sm:$0xff] }
  0x83   :  { %233 = vmatmul.mubr.bf16.vlgmr.msra.gmra.mrb[0].mxu0 %v91_v47 }
 0x156   :  { %v234_v49 = vpop.f32.mrb[0].mxu0 }
 0x157   :  { %v235_v50 = vadd.f32 %v254_v48, %v234_v49  ;;  %v236_v51 = vpop.f32.mrb[1].mxu0 }
 0x158   :  { %v237_v52 = vpop.f32.mrb[2].mxu0 }
 0x159   :  { %v241_v53 = vmax.f32 %v235_v50, 0.0  ;;  %v238_v54 = vadd.f32 %v254_v48, %v237_v52  ;;  %v239_v55 = vpop.f32.mrb[3].mxu0 }
 0x15b   :  { %243 = vst [vmem:[%s387_s3] sm:$0xff] %v241_v53  ;;  %v242_v56 = vmax.f32 %v238_v54, 0.0 }
 0x15d   :  { %244 = vst [vmem:[%s387_s3 + $0x8] sm:$0xff] %v242_v56 }

</bundles_post_ra>
